<compile_context>
chip_gen: v5e
topology: v5e:2x2
jax: 0.10.0
libtpu: 0.0.40
codegen_flags: <defaults>
</compile_context>

<pallas_src>
import jax
import jax.numpy as jnp
from jax.experimental import pallas as pl
from jax.experimental.pallas import tpu as pltpu


def _round_up(x, m):
    return ((x + m - 1) // m) * m


def mlp_kernel(x_ref, w1_ref, b1_ref, w2_ref, b2_ref, w3_ref, b3_ref,
               w4_ref, b4_ref, o_ref):
    # bf16 MXU operands, f32 accumulation, f32 epilogue (bias + ReLU).
    x = x_ref[...].astype(jnp.bfloat16)

    # fc1 + ReLU   (input_size -> 256)
    h = jnp.dot(x, w1_ref[...], preferred_element_type=jnp.float32) + b1_ref[...]
    h = jnp.maximum(h, 0.0)
    # dropout: eval-mode identity

    # fc2 + ReLU   (256 -> 128)
    h = jnp.dot(h.astype(jnp.bfloat16), w2_ref[...],
                preferred_element_type=jnp.float32) + b2_ref[...]
    h = jnp.maximum(h, 0.0)

    # fc3 + ReLU   (128 -> 64)
    h = jnp.dot(h.astype(jnp.bfloat16), w3_ref[...],
                preferred_element_type=jnp.float32) + b3_ref[...]
    h = jnp.maximum(h, 0.0)

    # fc4          (64 -> num_classes; optionally lane-padded upstream)
    out = jnp.dot(h.astype(jnp.bfloat16), w4_ref[...],
                  preferred_element_type=jnp.float32) + b4_ref[...]
    o_ref[...] = out.astype(o_ref.dtype)


def prepare_params(params, *, pad_threshold=100):
    """One-time param prep (do NOT redo this per forward call):
      - cast weights to bf16 for the MXU (biases stay f32 for the f32 epilogue),
      - lane-pad fc4 to a multiple of 128 only when num_classes is large enough
        (pad fraction modest); for small C masked stores are cheaper than the
        inflated HBM writeback + slice pass."""
    C = params["w4"].shape[1]
    w4, b4 = params["w4"], params["b4"]
    if C >= pad_threshold and C % 128 != 0:
        C_pad = _round_up(C, 128)
        w4 = jnp.pad(w4, ((0, 0), (0, C_pad - C)))
        b4 = jnp.pad(b4, ((0, 0), (0, C_pad - C)))
    return {
        "w1": params["w1"].astype(jnp.bfloat16), "b1": params["b1"],
        "w2": params["w2"].astype(jnp.bfloat16), "b2": params["b2"],
        "w3": params["w3"].astype(jnp.bfloat16), "b3": params["b3"],
        "w4": w4.astype(jnp.bfloat16), "b4": b4,
        "num_classes": C,
    }


def mlp_forward(x, prepared, *, batch_tile=2048, out_dtype=jnp.float32):
    """x: (B, input_size) float32 (or bf16 from a producer).
    prepared: output of prepare_params(). out_dtype: f32 default; pass bf16 to
    halve the output writeback if the consumer tolerates it."""
    B, D_in = x.shape
    w1, b1 = prepared["w1"], prepared["b1"]   # (D_in, 256), (1, 256)
    w2, b2 = prepared["w2"], prepared["b2"]   # (256, 128),  (1, 128)
    w3, b3 = prepared["w3"], prepared["b3"]   # (128, 64),   (1, 64)
    w4, b4 = prepared["w4"], prepared["b4"]   # (64, C_store), (1, C_store)
    C = prepared["num_classes"]
    C_store = w4.shape[1]                     # == C unless pre-padded for large C

    # --- adaptive batch tile, no wrapper-side padding of x ---------------------
    bt = min(batch_tile, _round_up(B, 8))           # clamp for small B
    bt = min(bt, max(8, _round_up(pl.cdiv(B, 2), 8)))  # >=2 grid steps when possible
    bt = _round_up(bt, 8)                           # sublane alignment
    grid = (pl.cdiv(B, bt),)                        # ragged last block is masked

    full = lambda shape: pl.BlockSpec(shape, lambda i: (0, 0))

    flops = 2 * B * (D_in * 256 + 256 * 128 + 128 * 64 + 64 * C_store)
    bytes_accessed = (
        B * D_in * x.dtype.itemsize
        + B * C_store * jnp.dtype(out_dtype).itemsize
        + 2 * (D_in * 256 + 256 * 128 + 128 * 64 + 64 * C_store)   # bf16 weights
        + 4 * (256 + 128 + 64 + C_store)                            # f32 biases
    )

    out = pl.pallas_call(
        mlp_kernel,
        out_shape=jax.ShapeDtypeStruct((B, C_store), out_dtype),
        grid_spec=pltpu.PrefetchScalarGridSpec(
            num_scalar_prefetch=0,
            grid=grid,
            in_specs=[
                pl.BlockSpec((bt, D_in), lambda i: (i, 0)),  # x tile
                full(w1.shape), full(b1.shape),
                full(w2.shape), full(b2.shape),
                full(w3.shape), full(b3.shape),
                full(w4.shape), full(b4.shape),
            ],
            out_specs=pl.BlockSpec((bt, C_store), lambda i: (i, 0)),
        ),
        compiler_params=pltpu.CompilerParams(
            dimension_semantics=("parallel",)),
        cost_estimate=pl.CostEstimate(
            flops=flops, transcendentals=0, bytes_accessed=bytes_accessed),
    )(x, w1, b1, w2, b2, w3, b3, w4, b4)

    if C_store != C:
        out = out[:, :C]
    return out


def init_params(key, input_size, num_classes):
    """Deterministic init. Weights stored transposed: (in_features, out_features)."""
    dims = [(input_size, 256), (256, 128), (128, 64), (64, num_classes)]
    params = {}
    for idx, (din, dout) in enumerate(dims, start=1):
        key, kw, kb = jax.random.split(key, 3)
        bound = 1.0 / jnp.sqrt(jnp.float32(din))  # PyTorch nn.Linear default range
        w = jax.random.uniform(kw, (din, dout), jnp.float32, -bound, bound)
        b = jax.random.uniform(kb, (1, dout), jnp.float32, -bound, bound)
        params[f"w{idx}"] = w
        params[f"b{idx}"] = b
    return params


def mlp_reference(x, params):
    h = jnp.maximum(x @ params["w1"] + params["b1"], 0.0)
    h = jnp.maximum(h @ params["w2"] + params["b2"], 0.0)
    h = jnp.maximum(h @ params["w3"] + params["b3"], 0.0)
    return h @ params["w4"] + params["b4"]


if __name__ == "__main__":
    key = jax.random.PRNGKey(0)
    input_size, num_classes, batch = 32, 10, 8

    kx, kp = jax.random.split(key)
    x = jax.random.normal(kx, (batch, input_size), jnp.float32)
    params = init_params(kp, input_size, num_classes)
    prepared = prepare_params(params)      # one-time bf16 cast (+ optional pad)

    out = mlp_forward(x, prepared)         # adaptive tile handles small B
    out = jax.block_until_ready(out)

    ref = mlp_reference(x, params)         # f32 reference
    assert out.shape == (batch, num_classes)
    # bf16 matmul operands (f32 accumulation) -> loosened tolerance vs f32 reference
    assert jnp.allclose(out, ref, atol=5e-2, rtol=5e-2), "mismatch vs reference"
    print("KERNEL_OK")
</pallas_src>

<mosaic_0001>
module attributes {stable_mosaic.version = 11 : i64} {
  func.func @mlp_kernel(%arg0: i32, %arg1: memref<8x32xf32, #tpu.memory_space<vmem>>, %arg2: memref<32x256xbf16, #tpu.memory_space<vmem>>, %arg3: memref<1x256xf32, #tpu.memory_space<vmem>>, %arg4: memref<256x128xbf16, #tpu.memory_space<vmem>>, %arg5: memref<1x128xf32, #tpu.memory_space<vmem>>, %arg6: memref<128x64xbf16, #tpu.memory_space<vmem>>, %arg7: memref<1x64xf32, #tpu.memory_space<vmem>>, %arg8: memref<64x10xbf16, #tpu.memory_space<vmem>>, %arg9: memref<1x10xf32, #tpu.memory_space<vmem>>, %arg10: memref<8x10xf32, #tpu.memory_space<vmem>>) attributes {dimension_semantics = [#tpu.dimension_semantics<parallel>], iteration_bounds = array<i64: 1>, scalar_prefetch = 0 : i64, scratch_operands = 0 : i64, tpu.core_type = #tpu.core_type<tc>, window_params = [{transform_indices = @transform_0, window_bounds = array<i64: 8, 32>}, {pipeline_mode = #tpu.pipeline_mode<synchronous>, transform_indices = @transform_1, window_bounds = array<i64: 32, 256>}, {pipeline_mode = #tpu.pipeline_mode<synchronous>, transform_indices = @transform_2, window_bounds = array<i64: 1, 256>}, {pipeline_mode = #tpu.pipeline_mode<synchronous>, transform_indices = @transform_3, window_bounds = array<i64: 256, 128>}, {pipeline_mode = #tpu.pipeline_mode<synchronous>, transform_indices = @transform_4, window_bounds = array<i64: 1, 128>}, {pipeline_mode = #tpu.pipeline_mode<synchronous>, transform_indices = @transform_5, window_bounds = array<i64: 128, 64>}, {pipeline_mode = #tpu.pipeline_mode<synchronous>, transform_indices = @transform_6, window_bounds = array<i64: 1, 64>}, {pipeline_mode = #tpu.pipeline_mode<synchronous>, transform_indices = @transform_7, window_bounds = array<i64: 64, 10>}, {pipeline_mode = #tpu.pipeline_mode<synchronous>, transform_indices = @transform_8, window_bounds = array<i64: 1, 10>}, {transform_indices = @transform_9, window_bounds = array<i64: 8, 10>}]} {
    %c0 = arith.constant 0 : index
    %c0_0 = arith.constant 0 : index
    %0 = vector.load %arg1[%c0, %c0_0] : memref<8x32xf32, #tpu.memory_space<vmem>>, vector<8x32xf32>
    %1 = arith.truncf %0 : vector<8x32xf32> to vector<8x32xbf16>
    %c0_1 = arith.constant 0 : index
    %c0_2 = arith.constant 0 : index
    %2 = vector.load %arg2[%c0_1, %c0_2] : memref<32x256xbf16, #tpu.memory_space<vmem>>, vector<32x256xbf16>
    %cst = arith.constant dense<0.000000e+00> : vector<8x256xf32>
    %3 = tpu.matmul %1, %2, %cst {dimension_numbers = #tpu.dot_dimension_numbers<[1], [0], [0], [1], [0, 0, 1, 1], [], []>} : vector<8x32xbf16>, vector<32x256xbf16>, vector<8x256xf32> -> vector<8x256xf32>
    %c0_3 = arith.constant 0 : index
    %c0_4 = arith.constant 0 : index
    %4 = vector.load %arg3[%c0_3, %c0_4] : memref<1x256xf32, #tpu.memory_space<vmem>>, vector<1x256xf32>
    %5 = vector.broadcast %4 : vector<1x256xf32> to vector<8x256xf32>
    %6 = arith.addf %3, %5 : vector<8x256xf32>
    %cst_5 = arith.constant 0.000000e+00 : f32
    %7 = vector.broadcast %cst_5 : f32 to vector<8x256xf32>
    %8 = arith.maximumf %6, %7 : vector<8x256xf32>
    %9 = arith.truncf %8 : vector<8x256xf32> to vector<8x256xbf16>
    %c0_6 = arith.constant 0 : index
    %c0_7 = arith.constant 0 : index
    %10 = vector.load %arg4[%c0_6, %c0_7] : memref<256x128xbf16, #tpu.memory_space<vmem>>, vector<256x128xbf16>
    %cst_8 = arith.constant dense<0.000000e+00> : vector<8x128xf32>
    %11 = tpu.matmul %9, %10, %cst_8 {dimension_numbers = #tpu.dot_dimension_numbers<[1], [0], [0], [1], [0, 0, 1, 1], [], []>} : vector<8x256xbf16>, vector<256x128xbf16>, vector<8x128xf32> -> vector<8x128xf32>
    %c0_9 = arith.constant 0 : index
    %c0_10 = arith.constant 0 : index
    %12 = vector.load %arg5[%c0_9, %c0_10] : memref<1x128xf32, #tpu.memory_space<vmem>>, vector<1x128xf32>
    %13 = vector.broadcast %12 : vector<1x128xf32> to vector<8x128xf32>
    %14 = arith.addf %11, %13 : vector<8x128xf32>
    %cst_11 = arith.constant 0.000000e+00 : f32
    %15 = vector.broadcast %cst_11 : f32 to vector<8x128xf32>
    %16 = arith.maximumf %14, %15 : vector<8x128xf32>
    %17 = arith.truncf %16 : vector<8x128xf32> to vector<8x128xbf16>
    %c0_12 = arith.constant 0 : index
    %c0_13 = arith.constant 0 : index
    %18 = vector.load %arg6[%c0_12, %c0_13] : memref<128x64xbf16, #tpu.memory_space<vmem>>, vector<128x64xbf16>
    %cst_14 = arith.constant dense<0.000000e+00> : vector<8x64xf32>
    %19 = tpu.matmul %17, %18, %cst_14 {dimension_numbers = #tpu.dot_dimension_numbers<[1], [0], [0], [1], [0, 0, 1, 1], [], []>} : vector<8x128xbf16>, vector<128x64xbf16>, vector<8x64xf32> -> vector<8x64xf32>
    %c0_15 = arith.constant 0 : index
    %c0_16 = arith.constant 0 : index
    %20 = vector.load %arg7[%c0_15, %c0_16] : memref<1x64xf32, #tpu.memory_space<vmem>>, vector<1x64xf32>
    %21 = vector.broadcast %20 : vector<1x64xf32> to vector<8x64xf32>
    %22 = arith.addf %19, %21 : vector<8x64xf32>
    %cst_17 = arith.constant 0.000000e+00 : f32
    %23 = vector.broadcast %cst_17 : f32 to vector<8x64xf32>
    %24 = arith.maximumf %22, %23 : vector<8x64xf32>
    %25 = arith.truncf %24 : vector<8x64xf32> to vector<8x64xbf16>
    %c0_18 = arith.constant 0 : index
    %c0_19 = arith.constant 0 : index
    %26 = vector.load %arg8[%c0_18, %c0_19] : memref<64x10xbf16, #tpu.memory_space<vmem>>, vector<64x10xbf16>
    %cst_20 = arith.constant dense<0.000000e+00> : vector<8x10xf32>
    %27 = tpu.matmul %25, %26, %cst_20 {dimension_numbers = #tpu.dot_dimension_numbers<[1], [0], [0], [1], [0, 0, 1, 1], [], []>} : vector<8x64xbf16>, vector<64x10xbf16>, vector<8x10xf32> -> vector<8x10xf32>
    %c0_21 = arith.constant 0 : index
    %c0_22 = arith.constant 0 : index
    %28 = vector.load %arg9[%c0_21, %c0_22] : memref<1x10xf32, #tpu.memory_space<vmem>>, vector<1x10xf32>
    %29 = vector.broadcast %28 : vector<1x10xf32> to vector<8x10xf32>
    %30 = arith.addf %27, %29 : vector<8x10xf32>
    %c0_23 = arith.constant 0 : index
    %c0_24 = arith.constant 0 : index
    %31 = vector.load %arg10[%c0_23, %c0_24] : memref<8x10xf32, #tpu.memory_space<vmem>>, vector<8x10xf32>
    tpu.vector_store %arg10[%c0_23, %c0_24], %30 {strides = array<i32>} : memref<8x10xf32, #tpu.memory_space<vmem>>, vector<8x10xf32>,
    return
  }
  func.func @transform_0(%arg0: i32) -> (i32, i32) {
    %c0_i32 = arith.constant 0 : i32
    %c0_i32_0 = arith.constant 0 : i32
    return %arg0, %c0_i32 : i32, i32
  }
  func.func @transform_1(%arg0: i32) -> (i32, i32) {
    %c0_i32 = arith.constant 0 : i32
    %c0_i32_0 = arith.constant 0 : i32
    %c0_i32_1 = arith.constant 0 : i32
    return %c0_i32, %c0_i32_0 : i32, i32
  }
  func.func @transform_2(%arg0: i32) -> (i32, i32) {
    %c0_i32 = arith.constant 0 : i32
    %c0_i32_0 = arith.constant 0 : i32
    %c0_i32_1 = arith.constant 0 : i32
    return %c0_i32, %c0_i32_0 : i32, i32
  }
  func.func @transform_3(%arg0: i32) -> (i32, i32) {
    %c0_i32 = arith.constant 0 : i32
    %c0_i32_0 = arith.constant 0 : i32
    %c0_i32_1 = arith.constant 0 : i32
    return %c0_i32, %c0_i32_0 : i32, i32
  }
  func.func @transform_4(%arg0: i32) -> (i32, i32) {
    %c0_i32 = arith.constant 0 : i32
    %c0_i32_0 = arith.constant 0 : i32
    %c0_i32_1 = arith.constant 0 : i32
    return %c0_i32, %c0_i32_0 : i32, i32
  }
  func.func @transform_5(%arg0: i32) -> (i32, i32) {
    %c0_i32 = arith.constant 0 : i32
    %c0_i32_0 = arith.constant 0 : i32
    %c0_i32_1 = arith.constant 0 : i32
    return %c0_i32, %c0_i32_0 : i32, i32
  }
  func.func @transform_6(%arg0: i32) -> (i32, i32) {
    %c0_i32 = arith.constant 0 : i32
    %c0_i32_0 = arith.constant 0 : i32
    %c0_i32_1 = arith.constant 0 : i32
    return %c0_i32, %c0_i32_0 : i32, i32
  }
  func.func @transform_7(%arg0: i32) -> (i32, i32) {
    %c0_i32 = arith.constant 0 : i32
    %c0_i32_0 = arith.constant 0 : i32
    %c0_i32_1 = arith.constant 0 : i32
    return %c0_i32, %c0_i32_0 : i32, i32
  }
  func.func @transform_8(%arg0: i32) -> (i32, i32) {
    %c0_i32 = arith.constant 0 : i32
    %c0_i32_0 = arith.constant 0 : i32
    %c0_i32_1 = arith.constant 0 : i32
    return %c0_i32, %c0_i32_0 : i32, i32
  }
  func.func @transform_9(%arg0: i32) -> (i32, i32) {
    %c0_i32 = arith.constant 0 : i32
    %c0_i32_0 = arith.constant 0 : i32
    return %arg0, %c0_i32 : i32, i32
  }
}

</mosaic_0001>

<bundles_post_ra>
// kernel: tpu_custom_call.1
= control target key start
LH: loop header
LB: loop body
LE: loop exit
PB: predicated region body
PF: predicated region fallthrough
CT: control target
= control target key end

     0   :  { %14 = vsyncpa [#allocation3], 0  ;;  %s812_s0 = inlined_call_operand.vmem [shape: f32[8,32], index: 0, kind: input, shape index: {}]   ;;  %s813_s1 = inlined_call_operand.hbm [shape: bf16[32,256], index: 1, kind: input, shape index: {}]   ;;  %s814_s2 = inlined_call_operand.vmem [shape: f32[1,256], index: 2, kind: input, shape index: {}]   ;;  %s815_s3 = inlined_call_operand.vmem [shape: bf16[256,128], index: 3, kind: input, shape index: {}]   ;;  %s816_s4 = inlined_call_operand.vmem [shape: f32[1,128], index: 4, kind: input, shape index: {}]   ;;  %s817_s5 = inlined_call_operand.vmem [shape: bf16[128,64], index: 5, kind: input, shape index: {}]   ;;  %s818_s6 = inlined_call_operand.vmem [shape: f32[1,64], index: 6, kind: input, shape index: {}]   ;;  %s819_s7 = inlined_call_operand.vmem [shape: bf16[64,10], index: 7, kind: input, shape index: {}]   ;;  %s820_s8 = inlined_call_operand.vmem [shape: f32[1,10], index: 8, kind: input, shape index: {}]   ;;  %s821_s9 = inlined_call_operand.hbm [shape: f32[8,10], index: 9, kind: output, shape index: {}]  }
   0x1   :  { %15 = vsyncpa [#allocation4], 0  ;;  %s22_s11 = sshll.u32 %s813_s1, 4  ;;  %s653_s12 = smov [#allocation2]   ;;  %s23_s11 = int_to_ptr.hbm [resolvable:$true] %s22_s11 }
   0x2   :  { %s24_s13 = sshll.u32 %s653_s12, 4  ;;  %s654_s14 = smov 128   ;;  %s25_s13 = int_to_ptr.vmem [resolvable:$true] %s24_s13 }
   0x3   :  { %s655_s15 = smov 8  }
   0x4   :  { %30 = dma.hbm_to_vmem [thread:$0]  %s23_s11, 512, %s25_s13, [#allocation3], %s654_s14, %s654_s14, %s655_s15  }
   0x5   :  { %649 = dma.done.wait [#allocation3], 512  }
   0x6   :  { %650 = vsyncadd [#allocation3], 4294966784  ;;  %v441_v0 = vld [vmem:[#allocation2 + $0x10] sm:$0xf]  ;;  %v565_v1 = vld [vmem:[#allocation2 + $0x14] sm:$0xf0] }
   0x7   :  { %v564_v2 = vld [vmem:[#allocation2 + $0x14] sm:$0xf]  ;;  %v442_v3 = vor.u32 %v565_v1, %v441_v0  ;;  %v443_v4 = vld [vmem:[#allocation2 + $0x18] sm:$0xf0]  ;;  %v433_v5 = vld [vmem:[#allocation2] sm:$0xf] }
   0x8   :  { %v563_v6 = vld [vmem:[#allocation2 + $0x4] sm:$0xf0]  ;;  %v446_v7 = vor.u32 %v564_v2, %v443_v4  ;;  %v562_v8 = vld [vmem:[#allocation2 + $0x4] sm:$0xf]  ;;  %v435_v9 = vld [vmem:[#allocation2 + $0x8] sm:$0xf0] }
   0x9   :  { %92 = vmatpush.bf16.msra.mxu0 %v442_v3  ;;  %v434_v10 = vor.u32 %v563_v6, %v433_v5  ;;  %v50_v11 = vld [vmem:[%s812_s0] sm:$0xff]  ;;  %v573_v12 = vld [vmem:[%s815_s3 + $0x38] sm:$0xff]  ;;  %v438_v14 = vor.u32 %v562_v8, %v435_v9  ;;  %v572_v15 = vld [vmem:[%s815_s3 + $0x30] sm:$0xff]  ;;  %vm82_vm0 = vcmask 261120   ;;  %vm395_vm1 = vcmask 523264   ;;  %s656_s30 = smov [#allocation5]  }
   0xa   :  { %v581_v13 = vld [vmem:[%s815_s3 + $0x78] sm:$0xff]  ;;  %105 = vmatpush.bf16.msra.mxu1 %v446_v7  ;;  %248 = vmatpush.bf16.msra.mxu2 %v573_v12  ;;  %v580_v16 = vld [vmem:[%s815_s3 + $0x70] sm:$0xff]  ;;  %v51_v17 = vpack.c.bf16 %v50_v11, %v50_v11  ;;  %v571_v18 = vld [vmem:[%s815_s3 + $0x28] sm:$0xff]  ;;  %s419_s10 = sshll.u32 %s656_s30, 4  ;;  %vm412_vm2 = vcmask 80896   ;;  %s420_s10 = int_to_ptr.vmem [resolvable:$true] %s419_s10 }
   0xb   :  { %261 = vmatpush.bf16.msra.mxu3 %v581_v13  ;;  %v579_v19 = vld [vmem:[%s815_s3 + $0x68] sm:$0xff]  ;;  %v570_v20 = vld [vmem:[%s815_s3 + $0x20] sm:$0xff]  ;;  %v569_v22 = vld [vmem:[%s815_s3 + $0x18] sm:$0xff] }
   0xc   :  { %v578_v21 = vld [vmem:[%s815_s3 + $0x60] sm:$0xff]  ;;  %v577_v23 = vld [vmem:[%s815_s3 + $0x58] sm:$0xff]  ;;  %v568_v24 = vld [vmem:[%s815_s3 + $0x10] sm:$0xff] }
   0xd   :  { %93 = vmatpush.bf16.msra.mxu0 %v434_v10  ;;  %v576_v25 = vld [vmem:[%s815_s3 + $0x50] sm:$0xff]  ;;  %v567_v26 = vld [vmem:[%s815_s3 + $0x8] sm:$0xff]  ;;  %v566_v28 = vld [vmem:[%s815_s3] sm:$0xff] }
   0xe   :  { %106 = vmatpush.bf16.msra.mxu1 %v438_v14  ;;  %249 = vmatpush.bf16.msra.mxu2 %v572_v15  ;;  %v575_v27 = vld [vmem:[%s815_s3 + $0x48] sm:$0xff]  ;;  %v574_v29 = vld [vmem:[%s815_s3 + $0x40] sm:$0xff]  ;;  %v589_v30 = vld [vmem:[%s817_s5 + $0x38] sm:$0xff]  ;;  %s421_s3 = sshll.u32 %s821_s9, 4  ;;  %s422_s3 = int_to_ptr.hbm [resolvable:$true] %s421_s3 }
   0xf   :  { %262 = vmatpush.bf16.msra.mxu3 %v580_v16  ;;  %v588_v31 = vld [vmem:[%s817_s5 + $0x30] sm:$0xff]  ;;  %v587_v32 = vld [vmem:[%s817_s5 + $0x28] sm:$0xff]  ;;  %v586_v33 = vld [vmem:[%s817_s5 + $0x20] sm:$0xff] }
  0x10   :  { %447 = vmatmul.msk.bf16.vlgmr.msra.gmra.mxu0 %vm82_vm0, %v51_v17  ;;  %v585_v34 = vld [vmem:[%s817_s5 + $0x18] sm:$0xff]  ;;  %v56_v35 = vld [vmem:[%s814_s2] sm:$0x3]  ;;  %v584_v36 = vld [vmem:[%s817_s5 + $0x10] sm:$0xff] }
  0x11   :  { %448 = vmatmul.msk.bf16.vlgmr.msra.gmra.mxu1 %vm82_vm0, %v51_v17  ;;  %344 = vmatpush.bf16.msrb.mxu0 %v589_v30  ;;  %v58_v37 = vperm.slane %v56_v35, 0  ;;  %v59_v38 = vperm.slane %v56_v35, 1  ;;  %v583_v49 = vld [vmem:[%s817_s5 + $0x8] sm:$0xff]  ;;  %v582_v50 = vld [vmem:[%s817_s5] sm:$0xff]  ;;  %v593_v51 = vld [vmem:[%s819_s7 + $0x18] sm:$0xff] }
  0x12   :  { %250 = vmatpush.bf16.msra.mxu2 %v571_v18  ;;  %403 = vmatpush.bf16.msrb.mxu1 %v593_v51  ;;  %v592_v52 = vld [vmem:[%s819_s7 + $0x10] sm:$0xff]  ;;  %v591_v53 = vld [vmem:[%s819_s7 + $0x8] sm:$0xff]  ;;  %v598_v54 = vld [vmem:[%s816_s4] ss:$0 sm:$0xff] }
  0x13   :  { %263 = vmatpush.bf16.msra.mxu3 %v579_v19  ;;  %v590_v63 = vld [vmem:[%s819_s7] sm:$0xff] }
  0x14   :  { %v599_v0 = vld [vmem:[%s818_s6] ss:$0 sm:$0xff] }
  0x15   :  { %345 = vmatpush.bf16.msrb.mxu0 %v588_v31  ;;  %v600_v6 = vld [vmem:[%s820_s8] ss:$0 sm:$0xff] }
  0x16   :  { %251 = vmatpush.bf16.msra.mxu2 %v570_v20  ;;  %404 = vmatpush.bf16.msrb.mxu1 %v592_v52 }
  0x17   :  { %264 = vmatpush.bf16.msra.mxu3 %v578_v21 }
  0x19   :  { %346 = vmatpush.bf16.msrb.mxu0 %v587_v32 }
  0x1a   :  { %252 = vmatpush.bf16.msra.mxu2 %v569_v22  ;;  %405 = vmatpush.bf16.msrb.mxu1 %v591_v53 }
  0x1b   :  { %265 = vmatpush.bf16.msra.mxu3 %v577_v23 }
  0x1d   :  { %347 = vmatpush.bf16.msrb.mxu0 %v586_v33 }
  0x1e   :  { %253 = vmatpush.bf16.msra.mxu2 %v568_v24  ;;  %406 = vmatpush.bf16.msrb.mxu1 %v590_v63 }
  0x1f   :  { %266 = vmatpush.bf16.msra.mxu3 %v576_v25 }
  0x21   :  { %348 = vmatpush.bf16.msrb.mxu0 %v585_v34 }
  0x22   :  { %254 = vmatpush.bf16.msra.mxu2 %v567_v26 }
  0x23   :  { %267 = vmatpush.bf16.msra.mxu3 %v575_v27 }
  0x25   :  { %349 = vmatpush.bf16.msrb.mxu0 %v584_v36 }
  0x26   :  { %255 = vmatpush.bf16.msra.mxu2 %v566_v28 }
  0x27   :  { %268 = vmatpush.bf16.msra.mxu3 %v574_v29 }
  0x29   :  { %350 = vmatpush.bf16.msrb.mxu0 %v583_v49 }
  0x2d   :  { %351 = vmatpush.bf16.msrb.mxu0 %v582_v50 }
  0x8d   :  { %v95_v39 = vpop.f32.mrf.mxu0 }
  0x8e   :  { %v96_v40 = vadd.f32 %v95_v39, %v58_v37  ;;  %v108_v41 = vpop.f32.mrf.mxu1 }
  0x8f   :  { %v109_v42 = vadd.f32 %v108_v41, %v59_v38 }
  0x90   :  { %v112_v43 = vmax.f32 %v96_v40, 0.0 }
  0x91   :  { %v113_v44 = vmax.f32 %v109_v42, 0.0 }
  0x92   :  { %v114_v45 = vpack.c.bf16 %v112_v43, %v112_v43 }
  0x93   :  { %v115_v46 = vpack.c.bf16 %v113_v44, %v113_v44 }
  0x94   :  { %256 = vmatmul.bf16.vlgmr.msra.gmra.mxu2 %v114_v45 }
  0x95   :  { %269 = vmatmul.bf16.vlgmr.msra.gmra.mxu3 %v115_v46  ;;  %v97_v47 = vpop.f32.mrf.mxu0 }
  0x96   :  { %v110_v48 = vpop.f32.mrf.mxu1 }
 0x117   :  { %v257_v55 = vpop.f32.mrf.mxu2 }
 0x118   :  { %v258_v56 = vadd.f32 %v598_v54, %v257_v55  ;;  %v270_v57 = vpop.f32.mrf.mxu3 }
 0x11a   :  { %v271_v58 = vadd.f32 %v270_v57, %v258_v56 }
 0x11c   :  { %v274_v59 = vmax.f32 %v271_v58, 0.0 }
 0x11e   :  { %v275_v60 = vpack.c.bf16 %v274_v59, %v274_v59 }
 0x11f   :  { %v259_v61 = vpop.f32.mrf.mxu2 }
 0x120   :  { %v272_v62 = vpop.f32.mrf.mxu3  ;;  %352 = vmatmul.bf16.vlgmr.msrb.gmra.mxu0 %v275_v60 }
 0x19d   :  { %v353_v1 = vpop.f32.mrf.mxu0 }
 0x19e   :  { %v354_v2 = vadd.f32 %v599_v0, %v353_v1 }
 0x1a0   :  { %v357_v3 = vmax.f32 %v354_v2, 0.0 }
 0x1a2   :  { %v358_v4 = vpack.c.bf16 %v357_v3, %v357_v3 }
 0x1a4   :  { %561 = vmatmul.msk.bf16.vlgmr.msrb.gmra.mxu1 %vm395_vm1, %v358_v4 }
 0x1a5   :  { %v355_v5 = vpop.f32.mrf.mxu0 }
 0x221   :  { %v408_v7 = vpop.f32.mrf.mxu1 }
 0x222   :  { %v409_v8 = vadd.f32 %v600_v6, %v408_v7 }
 0x224   :  { %413 = vst.msk [vmem:[#allocation5] sm:$0xff] %vm412_vm2, %v409_v8 }
 0x225   :  { %424 = dma.vmem_to_hbm [thread:$0]  %s420_s10, 128, %s422_s3, [#allocation4]  }
 0x229   :  { %v410_v9 = vpop.f32.mrf.mxu1 }
 0x22a   :  { %651 = dma.done.wait [#allocation4], 128  }
 0x22b   :  { %652 = vsyncadd [#allocation4], 4294967168 }
 0x22c   :  { %429 = vsyncpa [#allocation3], 1 }
 0x22d   :  { %430 = vsyncpa [#allocation4], 1 }

</bundles_post_ra>
